<compile_context>
chip_gen: v7x
topology: tpu7x:2x2x1
jax: 0.10.0
libtpu: 0.0.40
codegen_flags: <defaults>
</compile_context>

<pallas_src>
import jax
import jax.numpy as jnp
from jax.experimental import pallas as pl
from jax.experimental.pallas import tpu as pltpu

# bf16 into the MXU (accumulation stays f32).  Flip back to jnp.float32 to
# reproduce the PyTorch f32 numerics bit-for-bit (tolerance tightens to 1e-4).
MATMUL_DTYPE = jnp.bfloat16


def _round_up(x, m):
    return (x + m - 1) // m * m


def _pick_images_per_step(n, h, target_rows=256):
    """Largest divisor of n with b*h <= target_rows (fills the MXU M dim).

    target_rows=256 fills the 256-row v6e/v7x MXU (128 already fills v5e's).
    NOTE(v7x): when n is large, prefer a b that leaves an even number of grid
    steps so the "parallel" batch axis can be sharded over both TensorCores.
    """
    b = 1
    for d in range(1, n + 1):
        if n % d == 0 and d * h <= target_rows:
            b = d
    return b


def dense_layer_kernel(x_ref, wb_ref, scale_ref, shift_ref, bias_ref, o_ref):
    """Fused BN + ELU + 3x3 same-conv for a block of B images.

    x_ref    : (B, H, Kin_p)      NHWC images flattened to (H, W*Cin), f32,
                                  lane-padded to Kin_p (multiple of 128)
    wb_ref   : (3, Kin_p, Kout)   banded conv weights per kh tap (kw taps and
                                  the W-direction "same" padding folded in), bf16
    scale_ref: (1, Kin_p)         BN scale = gamma / sqrt(var + eps), tiled over W
    shift_ref: (1, Kin_p)         BN shift = beta - mean * scale, tiled over W
    bias_ref : (1, Kout)          conv bias, tiled over W
    o_ref    : (B, H, Kout)       output images, (H, W*Cout) lane-dense, f32
    """
    B, H, Kin_p = x_ref.shape
    Kout = o_ref.shape[2]
    M = B * H

    # --- BatchNorm (folded scale/shift) + ELU (alpha=1), f32 on the VPU -----
    # Padded lanes: x=0, scale=0, shift=0 -> ELU(0)=0, and they hit zero rows
    # of wb, so padding stays exact.
    x = x_ref[...].reshape(M, Kin_p)                    # (M, Kin_p)
    y = x * scale_ref[...] + shift_ref[...]             # broadcast once
    act = jnp.where(y > 0.0, y, jnp.exp(jnp.minimum(y, 0.0)) - 1.0)

    # --- kh taps: sublane rolls (XLU slot) + per-image masks ----------------
    # Rolls act on the flattened (B*H) axis; masking on the row-within-image
    # index (row % H) both implements the zero "same" padding in H and stops
    # rows from leaking across image boundaries inside a multi-image block.
    row = jax.lax.broadcasted_iota(jnp.int32, (M, Kin_p), 0) % H
    act_dn = jnp.where(row >= 1, pltpu.roll(act, shift=1, axis=0), 0.0)        # act[h-1]
    act_up = jnp.where(row <= H - 2, pltpu.roll(act, shift=M - 1, axis=0), 0.0)  # act[h+1]

    # --- three accumulated MXU dots (no (M, 3*Kin_p) concat copy) -----------
    mm = wb_ref.dtype                                   # bf16 into the MXU
    acc = jnp.dot(act_dn.astype(mm), wb_ref[0], preferred_element_type=jnp.float32)
    acc += jnp.dot(act.astype(mm), wb_ref[1], preferred_element_type=jnp.float32)
    acc += jnp.dot(act_up.astype(mm), wb_ref[2], preferred_element_type=jnp.float32)

    # Lane-dense (B*H, W*Cout) store; conv bias folded into this single add.
    o_ref[...] = (acc + bias_ref[...]).astype(o_ref.dtype).reshape(B, H, Kout)

    # Dropout2d(p=0.2): identity in eval mode (see TODO(synk) at top).


def prepare_params(weight_oihw, bias, gamma, beta, running_mean, running_var,
                   W, eps=1e-5):
    """One-off, weight-dependent preprocessing (hoisted out of the fwd path)."""
    Cout, Cin = weight_oihw.shape[0], weight_oihw.shape[1]
    Kin = W * Cin
    Kin_p = _round_up(Kin, 128)
    Kout = W * Cout

    # BN folded to per-lane scale/shift, tiled over W, lane-padded with zeros.
    scale = (gamma / jnp.sqrt(running_var + eps)).astype(jnp.float32)
    shift = (beta - running_mean * scale).astype(jnp.float32)
    scale_t = jnp.pad(jnp.tile(scale, W), (0, Kin_p - Kin)).reshape(1, Kin_p)
    shift_t = jnp.pad(jnp.tile(shift, W), (0, Kin_p - Kin)).reshape(1, Kin_p)
    bias_t = jnp.tile(bias, W).reshape(1, Kout).astype(jnp.float32)

    # Banded conv weights: fold the kw taps + the W-direction "same" padding.
    # wb[kh, wi*Cin + ci, wo*Cout + co] = w_hwio[kh, wi-wo+1, ci, co]
    # for wi-wo+1 in {0,1,2}, else 0.
    w_hwio = jnp.transpose(weight_oihw, (2, 3, 1, 0)).astype(jnp.float32)  # (3,3,Cin,Cout)
    kw = jnp.arange(W)[:, None] - jnp.arange(W)[None, :] + 1               # (W_in, W_out)
    valid = ((kw >= 0) & (kw <= 2)).astype(jnp.float32)
    band = w_hwio[:, jnp.clip(kw, 0, 2)] * valid[None, :, :, None, None]   # (3,W,W,Cin,Cout)
    wb = jnp.transpose(band, (0, 1, 3, 2, 4)).reshape(3, Kin, Kout)
    wb = jnp.pad(wb, ((0, 0), (0, Kin_p - Kin), (0, 0))).astype(MATMUL_DTYPE)
    return wb, scale_t, shift_t, bias_t


@jax.jit
def dense_layer_fwd(x_nchw, wb, scale_t, shift_t, bias_t):
    """Per-call forward: activation layout + fused Pallas kernel + out layout."""
    N, Cin, H, W = x_nchw.shape
    Kin = W * Cin
    Kin_p = wb.shape[1]
    Kout = wb.shape[2]
    Cout = Kout // W

    # NCHW -> NHWC -> (N, H, W*Cin), lane-padded to a 128 multiple (unmasked loads).
    x = jnp.transpose(x_nchw, (0, 2, 3, 1)).astype(jnp.float32).reshape(N, H, Kin)
    x = jnp.pad(x, ((0, 0), (0, 0), (0, Kin_p - Kin)))

    B = _pick_images_per_step(N, H)          # images per grid step (fills MXU M)

    out = pl.pallas_call(
        dense_layer_kernel,
        out_shape=jax.ShapeDtypeStruct((N, H, Kout), jnp.float32),
        grid_spec=pltpu.PrefetchScalarGridSpec(
            num_scalar_prefetch=0,
            grid=(N // B,),
            in_specs=[
                pl.BlockSpec((B, H, Kin_p), lambda n: (n, 0, 0)),
                pl.BlockSpec((3, Kin_p, Kout), lambda n: (0, 0, 0)),
                pl.BlockSpec((1, Kin_p), lambda n: (0, 0)),
                pl.BlockSpec((1, Kin_p), lambda n: (0, 0)),
                pl.BlockSpec((1, Kout), lambda n: (0, 0)),
            ],
            out_specs=pl.BlockSpec((B, H, Kout), lambda n: (n, 0, 0)),
        ),
        # No vmem_limit_bytes: the double-buffered footprint here is <1 MiB;
        # requesting 64 MiB would claim all of a v7x core's physical VMEM.
        compiler_params=pltpu.CompilerParams(
            dimension_semantics=("parallel",),
        ),
    )(x, wb, scale_t, shift_t, bias_t)

    # (N, H, W*Cout) -> NCHW
    out = out.reshape(N, H, W, Cout)
    return jnp.transpose(out, (0, 3, 1, 2))


def reference(x_nchw, weight_oihw, bias, gamma, beta, running_mean,
              running_var, eps=1e-5):
    """Plain-JAX reference mirroring the PyTorch eval forward."""
    scale = gamma / jnp.sqrt(running_var + eps)
    shift = beta - running_mean * scale
    y = x_nchw * scale[None, :, None, None] + shift[None, :, None, None]
    act = jnp.where(y > 0, y, jnp.exp(jnp.minimum(y, 0.0)) - 1.0)
    out = jax.lax.conv_general_dilated(
        act, weight_oihw, window_strides=(1, 1), padding="SAME",
        dimension_numbers=("NCHW", "OIHW", "NCHW"))
    return out + bias[None, :, None, None]


if __name__ == "__main__":
    # Small shapes consistent with the module: NCHW input.
    N, Cin, Cout, H, W = 2, 4, 8, 16, 16

    key = jax.random.PRNGKey(0)
    kx, kw, kb, kg, kbeta, kmean, kvar = jax.random.split(key, 7)

    x = jax.random.normal(kx, (N, Cin, H, W), dtype=jnp.float32)

    # Deterministic synthetic parameters (shapes from nn.Module __init__).
    weight = 0.1 * jax.random.normal(kw, (Cout, Cin, 3, 3), dtype=jnp.float32)
    bias = 0.1 * jax.random.normal(kb, (Cout,), dtype=jnp.float32)
    gamma = 1.0 + 0.1 * jax.random.normal(kg, (Cin,), dtype=jnp.float32)
    beta = 0.1 * jax.random.normal(kbeta, (Cin,), dtype=jnp.float32)
    running_mean = 0.1 * jax.random.normal(kmean, (Cin,), dtype=jnp.float32)
    running_var = 0.5 + jnp.abs(jax.random.normal(kvar, (Cin,),
                                                  dtype=jnp.float32))

    # Precompute weight-dependent tensors once; only dense_layer_fwd runs per step.
    wb, scale_t, shift_t, bias_t = prepare_params(
        weight, bias, gamma, beta, running_mean, running_var, W)

    out = dense_layer_fwd(x, wb, scale_t, shift_t, bias_t)
    out = jax.block_until_ready(out)

    ref = reference(x, weight, bias, gamma, beta, running_mean, running_var)
    assert out.shape == (N, Cout, H, W), out.shape
    tol = 2e-2 if MATMUL_DTYPE == jnp.bfloat16 else 1e-4
    assert jnp.allclose(out, ref, atol=tol, rtol=tol), (
        float(jnp.max(jnp.abs(out - ref))))

    print("KERNEL_OK")
</pallas_src>

<mosaic_0001>
module attributes {stable_mosaic.version = 11 : i64} {
  func.func @dense_layer_kernel(%arg0: i32, %arg1: memref<2x16x128xf32, #tpu.memory_space<vmem>>, %arg2: memref<3x128x128xbf16, #tpu.memory_space<vmem>>, %arg3: memref<1x128xf32, #tpu.memory_space<vmem>>, %arg4: memref<1x128xf32, #tpu.memory_space<vmem>>, %arg5: memref<1x128xf32, #tpu.memory_space<vmem>>, %arg6: memref<2x16x128xf32, #tpu.memory_space<vmem>>) attributes {dimension_semantics = [#tpu.dimension_semantics<parallel>], iteration_bounds = array<i64: 1>, scalar_prefetch = 0 : i64, scratch_operands = 0 : i64, tpu.core_type = #tpu.core_type<tc>, window_params = [{transform_indices = @transform_0, window_bounds = array<i64: 2, 16, 128>}, {pipeline_mode = #tpu.pipeline_mode<synchronous>, transform_indices = @transform_1, window_bounds = array<i64: 3, 128, 128>}, {pipeline_mode = #tpu.pipeline_mode<synchronous>, transform_indices = @transform_2, window_bounds = array<i64: 1, 128>}, {pipeline_mode = #tpu.pipeline_mode<synchronous>, transform_indices = @transform_3, window_bounds = array<i64: 1, 128>}, {pipeline_mode = #tpu.pipeline_mode<synchronous>, transform_indices = @transform_4, window_bounds = array<i64: 1, 128>}, {transform_indices = @transform_5, window_bounds = array<i64: 2, 16, 128>}]} {
    %c0 = arith.constant 0 : index
    %c0_0 = arith.constant 0 : index
    %c0_1 = arith.constant 0 : index
    %0 = vector.load %arg1[%c0, %c0_0, %c0_1] : memref<2x16x128xf32, #tpu.memory_space<vmem>>, vector<2x16x128xf32>
    %1 = vector.shape_cast %0 : vector<2x16x128xf32> to vector<32x128xf32>
    %c0_2 = arith.constant 0 : index
    %c0_3 = arith.constant 0 : index
    %2 = vector.load %arg3[%c0_2, %c0_3] : memref<1x128xf32, #tpu.memory_space<vmem>>, vector<1x128xf32>
    %3 = vector.broadcast %2 : vector<1x128xf32> to vector<32x128xf32>
    %4 = arith.mulf %1, %3 : vector<32x128xf32>
    %c0_4 = arith.constant 0 : index
    %c0_5 = arith.constant 0 : index
    %5 = vector.load %arg4[%c0_4, %c0_5] : memref<1x128xf32, #tpu.memory_space<vmem>>, vector<1x128xf32>
    %6 = vector.broadcast %5 : vector<1x128xf32> to vector<32x128xf32>
    %7 = arith.addf %4, %6 : vector<32x128xf32>
    %cst = arith.constant 0.000000e+00 : f32
    %8 = vector.broadcast %cst : f32 to vector<32x128xf32>
    %9 = arith.cmpf ogt, %7, %8 : vector<32x128xf32>
    %cst_6 = arith.constant 0.000000e+00 : f32
    %10 = vector.broadcast %cst_6 : f32 to vector<32x128xf32>
    %11 = arith.minimumf %7, %10 : vector<32x128xf32>
    %12 = math.exp %11 : vector<32x128xf32>
    %cst_7 = arith.constant 1.000000e+00 : f32
    %13 = vector.broadcast %cst_7 : f32 to vector<32x128xf32>
    %14 = arith.subf %12, %13 : vector<32x128xf32>
    %15 = arith.select %9, %7, %14 : vector<32x128xi1>, vector<32x128xf32>
    %16 = tpu.iota {dimensions = array<i32: 0>} : vector<32x128xi32>
    %c16_i32 = arith.constant 16 : i32
    %c0_i32 = arith.constant 0 : i32
    %17 = arith.cmpi eq, %c16_i32, %c0_i32 : i32
    %c1_i32 = arith.constant 1 : i32
    %18 = arith.select %17, %c1_i32, %c16_i32 : i32
    %19 = vector.broadcast %18 : i32 to vector<32x128xi32>
    %20 = arith.remsi %16, %19 : vector<32x128xi32>
    %c0_i32_8 = arith.constant 0 : i32
    %21 = vector.broadcast %c0_i32_8 : i32 to vector<32x128xi32>
    %22 = arith.cmpi ne, %20, %21 : vector<32x128xi32>
    %c0_i32_9 = arith.constant 0 : i32
    %23 = vector.broadcast %c0_i32_9 : i32 to vector<32x128xi32>
    %24 = arith.cmpi slt, %20, %23 : vector<32x128xi32>
    %c0_i32_10 = arith.constant 0 : i32
    %25 = arith.cmpi slt, %18, %c0_i32_10 : i32
    %26 = vector.broadcast %25 : i1 to vector<32x128xi1>
    %27 = vector.broadcast %26 : vector<32x128xi1> to vector<32x128xi1>
    %28 = arith.xori %24, %27 : vector<32x128xi1>
    %29 = arith.andi %28, %22 : vector<32x128xi1>
    %30 = vector.broadcast %18 : i32 to vector<32x128xi32>
    %31 = arith.addi %20, %30 : vector<32x128xi32>
    %32 = arith.select %29, %31, %20 : vector<32x128xi1>, vector<32x128xi32>
    %c1_i32_11 = arith.constant 1 : i32
    %33 = vector.broadcast %c1_i32_11 : i32 to vector<32x128xi32>
    %34 = arith.cmpi sge, %32, %33 : vector<32x128xi32>
    %c1_i32_12 = arith.constant 1 : i32
    %35 = tpu.dynamic_rotate %15 by %c1_i32_12 dim 0 : vector<32x128xf32>, i32 -> vector<32x128xf32>
    %cst_13 = arith.constant 0.000000e+00 : f32
    %36 = vector.broadcast %cst_13 : f32 to vector<32x128xf32>
    %37 = arith.select %34, %35, %36 : vector<32x128xi1>, vector<32x128xf32>
    %c14_i32 = arith.constant 14 : i32
    %38 = vector.broadcast %c14_i32 : i32 to vector<32x128xi32>
    %39 = arith.cmpi sle, %32, %38 : vector<32x128xi32>
    %c31_i32 = arith.constant 31 : i32
    %40 = tpu.dynamic_rotate %15 by %c31_i32 dim 0 : vector<32x128xf32>, i32 -> vector<32x128xf32>
    %cst_14 = arith.constant 0.000000e+00 : f32
    %41 = vector.broadcast %cst_14 : f32 to vector<32x128xf32>
    %42 = arith.select %39, %40, %41 : vector<32x128xi1>, vector<32x128xf32>
    %43 = arith.truncf %37 : vector<32x128xf32> to vector<32x128xbf16>
    %c0_15 = arith.constant 0 : index
    %c0_16 = arith.constant 0 : index
    %c0_17 = arith.constant 0 : index
    %44 = vector.load %arg2[%c0_15, %c0_16, %c0_17] : memref<3x128x128xbf16, #tpu.memory_space<vmem>>, vector<1x128x128xbf16>
    %45 = vector.shape_cast %44 : vector<1x128x128xbf16> to vector<128x128xbf16>
    %cst_18 = arith.constant dense<0.000000e+00> : vector<32x128xf32>
    %46 = tpu.matmul %43, %45, %cst_18 {dimension_numbers = #tpu.dot_dimension_numbers<[1], [0], [0], [1], [0, 0, 1, 1], [], []>} : vector<32x128xbf16>, vector<128x128xbf16>, vector<32x128xf32> -> vector<32x128xf32>
    %47 = arith.truncf %15 : vector<32x128xf32> to vector<32x128xbf16>
    %c1 = arith.constant 1 : index
    %c0_19 = arith.constant 0 : index
    %c0_20 = arith.constant 0 : index
    %48 = vector.load %arg2[%c1, %c0_19, %c0_20] : memref<3x128x128xbf16, #tpu.memory_space<vmem>>, vector<1x128x128xbf16>
    %49 = vector.shape_cast %48 : vector<1x128x128xbf16> to vector<128x128xbf16>
    %cst_21 = arith.constant dense<0.000000e+00> : vector<32x128xf32>
    %50 = tpu.matmul %47, %49, %cst_21 {dimension_numbers = #tpu.dot_dimension_numbers<[1], [0], [0], [1], [0, 0, 1, 1], [], []>} : vector<32x128xbf16>, vector<128x128xbf16>, vector<32x128xf32> -> vector<32x128xf32>
    %51 = arith.addf %46, %50 : vector<32x128xf32>
    %52 = arith.truncf %42 : vector<32x128xf32> to vector<32x128xbf16>
    %c2 = arith.constant 2 : index
    %c0_22 = arith.constant 0 : index
    %c0_23 = arith.constant 0 : index
    %53 = vector.load %arg2[%c2, %c0_22, %c0_23] : memref<3x128x128xbf16, #tpu.memory_space<vmem>>, vector<1x128x128xbf16>
    %54 = vector.shape_cast %53 : vector<1x128x128xbf16> to vector<128x128xbf16>
    %cst_24 = arith.constant dense<0.000000e+00> : vector<32x128xf32>
    %55 = tpu.matmul %52, %54, %cst_24 {dimension_numbers = #tpu.dot_dimension_numbers<[1], [0], [0], [1], [0, 0, 1, 1], [], []>} : vector<32x128xbf16>, vector<128x128xbf16>, vector<32x128xf32> -> vector<32x128xf32>
    %56 = arith.addf %51, %55 : vector<32x128xf32>
    %c0_25 = arith.constant 0 : index
    %c0_26 = arith.constant 0 : index
    %57 = vector.load %arg5[%c0_25, %c0_26] : memref<1x128xf32, #tpu.memory_space<vmem>>, vector<1x128xf32>
    %58 = vector.broadcast %57 : vector<1x128xf32> to vector<32x128xf32>
    %59 = arith.addf %56, %58 : vector<32x128xf32>
    %60 = vector.shape_cast %59 : vector<32x128xf32> to vector<2x16x128xf32>
    %c0_27 = arith.constant 0 : index
    %c0_28 = arith.constant 0 : index
    %c0_29 = arith.constant 0 : index
    %61 = vector.load %arg6[%c0_27, %c0_28, %c0_29] : memref<2x16x128xf32, #tpu.memory_space<vmem>>, vector<2x16x128xf32>
    tpu.vector_store %arg6[%c0_27, %c0_28, %c0_29], %60 {strides = array<i32>} : memref<2x16x128xf32, #tpu.memory_space<vmem>>, vector<2x16x128xf32>,
    return
  }
  func.func @transform_0(%arg0: i32) -> (i32, i32, i32) {
    %c0_i32 = arith.constant 0 : i32
    %c0_i32_0 = arith.constant 0 : i32
    %c0_i32_1 = arith.constant 0 : i32
    return %arg0, %c0_i32, %c0_i32_0 : i32, i32, i32
  }
  func.func @transform_1(%arg0: i32) -> (i32, i32, i32) {
    %c0_i32 = arith.constant 0 : i32
    %c0_i32_0 = arith.constant 0 : i32
    %c0_i32_1 = arith.constant 0 : i32
    %c0_i32_2 = arith.constant 0 : i32
    return %c0_i32, %c0_i32_0, %c0_i32_1 : i32, i32, i32
  }
  func.func @transform_2(%arg0: i32) -> (i32, i32) {
    %c0_i32 = arith.constant 0 : i32
    %c0_i32_0 = arith.constant 0 : i32
    %c0_i32_1 = arith.constant 0 : i32
    return %c0_i32, %c0_i32_0 : i32, i32
  }
  func.func @transform_3(%arg0: i32) -> (i32, i32) {
    %c0_i32 = arith.constant 0 : i32
    %c0_i32_0 = arith.constant 0 : i32
    %c0_i32_1 = arith.constant 0 : i32
    return %c0_i32, %c0_i32_0 : i32, i32
  }
  func.func @transform_4(%arg0: i32) -> (i32, i32) {
    %c0_i32 = arith.constant 0 : i32
    %c0_i32_0 = arith.constant 0 : i32
    %c0_i32_1 = arith.constant 0 : i32
    return %c0_i32, %c0_i32_0 : i32, i32
  }
  func.func @transform_5(%arg0: i32) -> (i32, i32, i32) {
    %c0_i32 = arith.constant 0 : i32
    %c0_i32_0 = arith.constant 0 : i32
    %c0_i32_1 = arith.constant 0 : i32
    return %arg0, %c0_i32, %c0_i32_0 : i32, i32, i32
  }
}

</mosaic_0001>

<bundles_post_ra>
// kernel: dense_layer_fwd.1
= control target key start
LH: loop header
LB: loop body
LE: loop exit
PB: predicated region body
PF: predicated region fallthrough
CT: control target
= control target key end

     0   :  { %v71_v29 = vlaneseq  ;;  %vm734_vm8 = vmmov 1   ;;  %s939_s1 = inlined_call_operand.vmem [shape: bf16[3,128,128], index: 1, kind: input, shape index: {}]   ;;  %s940_s0 = inlined_call_operand.vmem [shape: f32[2,16,128], index: 0, kind: input, shape index: {}]   ;;  %s941_s2 = inlined_call_operand.vmem [shape: f32[1,128], index: 2, kind: input, shape index: {}]   ;;  %s942_s3 = inlined_call_operand.vmem [shape: f32[1,128], index: 3, kind: input, shape index: {}]   ;;  %s943_s4 = inlined_call_operand.vmem [shape: f32[1,128], index: 4, kind: input, shape index: {}]   ;;  %s944_s5 = inlined_call_operand.vmem [shape: f32[2,16,128], index: 5, kind: output, shape index: {}]  }
   0x1   :  { %v702_v0 = vld [vmem:[%s939_s1] sm:$0xff]   ;;  %v703_v1 = vld [vmem:[%s939_s1 + $0x8] sm:$0xff]   ;;  %v704_v2 = vld [vmem:[%s939_s1 + $0x10] sm:$0xff]  }
   0x2   :  { %653 = vmatprep.subr.bf16.mxu0 %v702_v0  ;;  %v705_v3 = vld [vmem:[%s939_s1 + $0x18] sm:$0xff]   ;;  %v710_v4 = vld [vmem:[%s939_s1 + $0x40] sm:$0xff]   ;;  %v22_v6 = vld [vmem:[%s940_s0 + $0x8] sm:$0xff]  ;;  %v831_v35 = vshrl.u32 %v71_v29, 7 }
   0x3   :  { %654 = vmatpush3.bf16.msra.mxu0 %v702_v0  ;;  %v21_v5 = vld [vmem:[%s940_s0] sm:$0xff]  ;;  %v24_v7 = vld [vmem:[%s940_s0 + $0x18] sm:$0xff]  ;;  %633 = vmatprep.subr.bf16.mxu1 %v710_v4  ;;  %v712_v14 = vld [vmem:[%s939_s1 + $0x48] sm:$0xff]  }
   0x4   :  { %655 = vmatprep.subr.bf16.mxu0 %v703_v1  ;;  %v528_v8 = vld [vmem:[%s941_s2] ss:$0 sm:$0xff]  ;;  %634 = vmatpush3.bf16.msra.mxu1 %v710_v4  ;;  %v23_v18 = vld [vmem:[%s940_s0 + $0x10] sm:$0xff]  ;;  %v707_v21 = vld [vmem:[%s939_s1 + $0x28] sm:$0xff]   ;;  %v80_v38 = vand.u32 15, %v831_v35  ;;  %v74_v39 = vadd.s32 16, %v831_v35 }
   0x5   :  { %v529_v9 = vld [vmem:[%s942_s3] ss:$0 sm:$0xff]  ;;  %v32_v11 = vmul.f32 %v528_v8, %v21_v5  ;;  %v33_v12 = vmul.f32 %v528_v8, %v22_v6  ;;  %v35_v13 = vmul.f32 %v528_v8, %v24_v7  ;;  %635 = vmatprep.subr.bf16.mxu1 %v712_v14  ;;  %v34_v19 = vmul.f32 %v528_v8, %v23_v18  ;;  %v714_v25 = vld [vmem:[%s939_s1 + $0x50] sm:$0xff]   ;;  %v716_v31 = vld [vmem:[%s939_s1 + $0x58] sm:$0xff]  }
   0x6   :  { %v706_v10 = vld [vmem:[%s939_s1 + $0x20] sm:$0xff]   ;;  %v708_v32 = vld [vmem:[%s939_s1 + $0x30] sm:$0xff]   ;;  %v709_v36 = vld [vmem:[%s939_s1 + $0x38] sm:$0xff]   ;;  %v73_v40 = vadd.s32 8, %v831_v35  ;;  %vm850_vm2 = vcmp.ge.s32.totalorder %v80_v38, 1  ;;  %vm132_vm3 = vcmp.lt.s32.totalorder %v831_v35, 1 }
   0x7   :  { %656 = vmatpush3.bf16.msra.mxu0 %v703_v1  ;;  %v801_v15 = vadd.f32 %v529_v9, %v32_v11  ;;  %v803_v16 = vadd.f32 %v529_v9, %v33_v12  ;;  %v805_v17 = vadd.f32 %v529_v9, %v35_v13  ;;  %v816_v24 = vadd.f32 %v529_v9, %v34_v19  ;;  %v718_v34 = vld [vmem:[%s939_s1 + $0x60] sm:$0xff]   ;;  %v720_v37 = vld [vmem:[%s939_s1 + $0x68] sm:$0xff]   ;;  %v722_v42 = vld [vmem:[%s939_s1 + $0x70] sm:$0xff]  }
   0x8   :  { %657 = vmatprep.subr.bf16.mxu0 %v704_v2  ;;  %636 = vmatpush3.bf16.msra.mxu1 %v712_v14  ;;  %v711_v41 = vld [vmem:[%s939_s1 + $0x80] sm:$0xff]   ;;  %v94_v49 = vand.u32 15, %v74_v39  ;;  %v87_v50 = vand.u32 15, %v73_v40  ;;  %v724_v54 = vld [vmem:[%s939_s1 + $0x78] sm:$0xff]   ;;  %vm149_vm6 = vcmp.lt.s32.totalorder %v831_v35, 7  ;;  %vm566_vm9 = vmpackc.low %vm734_vm8, %vm850_vm2 }
   0x9   :  { %v51_v20 = vmin.f32 %v801_v15, 0.0  ;;  %v52_v22 = vmin.f32 %v803_v16, 0.0  ;;  %v54_v23 = vmin.f32 %v805_v17, 0.0  ;;  %v53_v30 = vmin.f32 %v816_v24, 0.0  ;;  %637 = vmatprep.subr.bf16.mxu1 %v714_v25  ;;  %v713_v13 = vld [vmem:[%s939_s1 + $0x88] sm:$0xff]   ;;  %v723_v19 = vld [vmem:[%s939_s1 + $0xb0] sm:$0xff]  }
   0xa   :  { %vm47_vm0 = vcmp.gt.f32.partialorder %v801_v15, 0.0  ;;  %vm48_vm1 = vcmp.gt.f32.partialorder %v803_v16, 0.0  ;;  %vm50_vm4 = vcmp.gt.f32.partialorder %v805_v17, 0.0  ;;  %vm49_vm5 = vcmp.gt.f32.partialorder %v816_v24, 0.0  ;;  %v721_v18 = vld [vmem:[%s939_s1 + $0xa8] sm:$0xff]  }
   0xb   :  { %658 = vmatpush3.bf16.msra.mxu0 %v704_v2  ;;  %v55_v26 = vmul.f32 1.442695, %v51_v20  ;;  %v57_v27 = vmul.f32 1.442695, %v52_v22  ;;  %v61_v28 = vmul.f32 1.442695, %v54_v23 }
   0xc   :  { %659 = vmatprep.subr.bf16.mxu0 %v705_v3  ;;  %638 = vmatpush3.bf16.msra.mxu1 %v714_v25  ;;  %v59_v33 = vmul.f32 1.442695, %v53_v30  ;;  %vm874_vm7 = vcmp.ge.s32.totalorder %v94_v49, 1  ;;  %vm142_vm10 = vcmp.le.s32.totalorder %v87_v50, 14  ;;  %v75_v20 = vadd.s32 24, %v831_v35  ;;  %v725_v22 = vld [vmem:[%s939_s1 + $0xb8] sm:$0xff]  }
   0xd   :  { %726 = vpow2.f32 %v55_v26  ;;  %639 = vmatprep.subr.bf16.mxu1 %v716_v31  ;;  %vm569_vm11 = vmpackc.low %vm734_vm8, %vm874_vm7 }
   0xe   :  { %728 = vpow2.f32 %v57_v27  ;;  %vm596_vm12 = vmpackc.low %vm142_vm10, %vm734_vm8  ;;  %v101_v23 = vand.u32 15, %v75_v20 }
   0xf   :  { %660 = vmatpush3.bf16.msra.mxu0 %v705_v3  ;;  %730 = vpow2.f32 %v61_v28 }
  0x10   :  { %661 = vmatprep.subr.bf16.mxu0 %v706_v10  ;;  %732 = vpow2.f32 %v59_v33  ;;  %640 = vmatpush3.bf16.msra.mxu1 %v716_v31  ;;  %vm144_vm13 = vcmp.le.s32.totalorder %v101_v23, 14 }
  0x11   :  { %641 = vmatprep.subr.bf16.mxu1 %v718_v34  ;;  %vm599_vm14 = vmpackc.low %vm144_vm13, %vm734_vm8 }
  0x13   :  { %662 = vmatpush3.bf16.msra.mxu0 %v706_v10 }
  0x14   :  { %663 = vmatprep.subr.bf16.mxu0 %v707_v21  ;;  %642 = vmatpush3.bf16.msra.mxu1 %v718_v34 }
  0x15   :  { %643 = vmatprep.subr.bf16.mxu1 %v720_v37 }
  0x17   :  { %664 = vmatpush3.bf16.msra.mxu0 %v707_v21  ;;  %v727_v43 = vpop.eup %726 }
  0x18   :  { %665 = vmatprep.subr.bf16.mxu0 %v708_v32  ;;  %v729_v44 = vpop.eup %728  ;;  %v530_v45 = vadd.f32 -1.0, %v727_v43  ;;  %644 = vmatpush3.bf16.msra.mxu1 %v720_v37 }
  0x19   :  { %v731_v47 = vpop.eup %730  ;;  %v531_v48 = vadd.f32 -1.0, %v729_v44  ;;  %645 = vmatprep.subr.bf16.mxu1 %v722_v42 }
  0x1a   :  { %v733_v51 = vpop.eup %732  ;;  %v533_v52 = vadd.f32 -1.0, %v731_v47  ;;  %v857_v53 = vsel %vm47_vm0, %v801_v15, %v530_v45  ;;  %v715_v15 = vld [vmem:[%s939_s1 + $0x90] sm:$0xff]  }
  0x1b   :  { %666 = vmatpush3.bf16.msra.mxu0 %v708_v32  ;;  %v68_v55 = vsel %vm48_vm1, %v803_v16, %v531_v48  ;;  %v128_v56 = vrot.slane %v857_v53, 7  ;;  %v145_v57 = vrot.slane %v857_v53, 1  ;;  %v532_v58 = vadd.f32 -1.0, %v733_v51  ;;  %v717_v16 = vld [vmem:[%s939_s1 + $0x98] sm:$0xff]   ;;  %v602_v32 = vld [vmem:[%s943_s4] ss:$0 sm:$0xff] }
  0x1c   :  { %667 = vmatprep.subr.bf16.mxu0 %v709_v36  ;;  %v70_v59 = vsel %vm50_vm4, %v805_v17, %v533_v52  ;;  %v129_v60 = vrot.slane %v68_v55, 7  ;;  %v146_v61 = vrot.slane %v68_v55, 1  ;;  %v176_v62 = vpack.c.bf16 %v68_v55, %v857_v53  ;;  %646 = vmatpush3.bf16.msra.mxu1 %v722_v42  ;;  %v719_v17 = vld [vmem:[%s939_s1 + $0xa0] sm:$0xff]  }
  0x1d   :  { %v131_v63 = vrot.slane %v70_v59, 7  ;;  %v69_v0 = vsel %vm49_vm5, %v816_v24, %v532_v58  ;;  %647 = vmatprep.subr.bf16.mxu1 %v724_v54  ;;  %v148_v21 = vrot.slane %v70_v59, 1 }
  0x1e   :  { %v135_v2 = vsel %vm132_vm3, %v128_v56, %v129_v60  ;;  %v130_v3 = vrot.slane %v69_v0, 7  ;;  %649 = vmatprep.mubr.bf16.mxu1 %v176_v62  ;;  %v147_v4 = vrot.slane %v69_v0, 1  ;;  %v177_v6 = vpack.c.bf16 %v70_v59, %v69_v0 }
  0x1f   :  { %668 = vmatpush3.bf16.msra.mxu0 %v709_v36  ;;  %v136_v5 = vsel %vm132_vm3, %v131_v63, %v128_v56  ;;  %v152_v7 = vsel %vm149_vm6, %v145_v57, %v146_v61  ;;  %v153_v25 = vsel %vm149_vm6, %v148_v21, %v145_v57 }
  0x20   :  { %673 = vmatprep.subr.bf16.mxu0 %v711_v41  ;;  %v567_v8 = vpack.c.bf16 %v135_v2, %v136_v5  ;;  %v133_v9 = vsel %vm132_vm3, %v130_v3, %v131_v63  ;;  %v134_v10 = vsel %vm132_vm3, %v129_v60, %v130_v3  ;;  %v151_v11 = vsel %vm149_vm6, %v146_v61, %v147_v4 }
  0x21   :  { %v570_v12 = vpack.c.bf16 %v133_v9, %v134_v10  ;;  %648 = vmatpush3.bf16.msra.mxu1 %v724_v54  ;;  %v597_v14 = vpack.c.bf16 %v151_v11, %v152_v7  ;;  %v150_v24 = vsel %vm149_vm6, %v147_v4, %v148_v21 }
  0x22   :  { %669 = vmatprep.mubr.msk.bf16.mxu0 %vm566_vm9, %v567_v8  ;;  %v600_v26 = vpack.c.bf16 %v153_v25, %v150_v24 }
  0x23   :  { %670 = vmatmul.mubr.msk.bf16.vlgmr.msra.gmra.mrb[0].mxu0 %vm569_vm11, %v570_v12 }
  0x24   :  { %674 = vmatpush3.bf16.msra.mxu0 %v711_v41  ;;  %650 = vmatmul.mubr.bf16.vlgmr.msra.gmra.mrb[0].mxu1 %v177_v6 }
  0x25   :  { %675 = vmatprep.subr.bf16.mxu0 %v713_v13  ;;  %689 = vmatprep.mubr.msk.bf16.mxu0 %vm596_vm12, %v597_v14 }
  0x28   :  { %676 = vmatpush3.bf16.msra.mxu0 %v713_v13 }
  0x29   :  { %677 = vmatprep.subr.bf16.mxu0 %v715_v15 }
  0x2c   :  { %678 = vmatpush3.bf16.msra.mxu0 %v715_v15 }
  0x2d   :  { %679 = vmatprep.subr.bf16.mxu0 %v717_v16 }
  0x30   :  { %680 = vmatpush3.bf16.msra.mxu0 %v717_v16 }
  0x31   :  { %681 = vmatprep.subr.bf16.mxu0 %v719_v17 }
  0x34   :  { %682 = vmatpush3.bf16.msra.mxu0 %v719_v17 }
  0x35   :  { %683 = vmatprep.subr.bf16.mxu0 %v721_v18 }
  0x38   :  { %684 = vmatpush3.bf16.msra.mxu0 %v721_v18 }
  0x39   :  { %685 = vmatprep.subr.bf16.mxu0 %v723_v19 }
  0x3c   :  { %686 = vmatpush3.bf16.msra.mxu0 %v723_v19 }
  0x3d   :  { %687 = vmatprep.subr.bf16.mxu0 %v725_v22 }
  0x40   :  { %688 = vmatpush3.bf16.msra.mxu0 %v725_v22 }
  0x43   :  { %690 = vmatmul.mubr.msk.bf16.vlgmr.msra.gmra.mrb[0].mxu0 %vm599_vm14, %v600_v26 }
  0xf7   :  { %v651_v27 = vpop.f32.mrb[0].mxu1 }
  0xf8   :  { %v277_v28 = vpop.f32.mrb[1].mxu1 }
  0xf9   :  { %v652_v29 = vpop.f32.mrb[2].mxu1 }
  0xfa   :  { %v280_v30 = vpop.f32.mrb[3].mxu1 }
 0x116   :  { %v691_v31 = vpop.f32.mrb[0].mxu0 }
 0x117   :  { %v693_v33 = vadd.f32 %v691_v31, %v651_v27  ;;  %v490_v34 = vpop.f32.mrb[1].mxu0 }
 0x118   :  { %v694_v35 = vadd.f32 %v490_v34, %v277_v28  ;;  %v692_v36 = vpop.f32.mrb[2].mxu0 }
 0x119   :  { %v518_v37 = vadd.f32 %v693_v33, %v602_v32  ;;  %v695_v38 = vadd.f32 %v692_v36, %v652_v29  ;;  %v493_v39 = vpop.f32.mrb[3].mxu0 }
 0x11a   :  { %v516_v40 = vadd.f32 %v694_v35, %v602_v32  ;;  %v696_v41 = vadd.f32 %v493_v39, %v280_v30 }
 0x11b   :  { %522 = vst [vmem:[%s944_s5 + $0x10] sm:$0xff] %v518_v37  ;;  %v519_v42 = vadd.f32 %v695_v38, %v602_v32 }
 0x11c   :  { %520 = vst [vmem:[%s944_s5] sm:$0xff] %v516_v40  ;;  %v517_v43 = vadd.f32 %v696_v41, %v602_v32 }
 0x11d   :  { %523 = vst [vmem:[%s944_s5 + $0x18] sm:$0xff] %v519_v42 }
 0x11e   :  { %521 = vst [vmem:[%s944_s5 + $0x8] sm:$0xff] %v517_v43 }

</bundles_post_ra>
